<compile_context>
chip_gen: v6e
topology: v6e:2x2x1
jax: 0.10.0
libtpu: 0.0.40
codegen_flags: <defaults>
</compile_context>

<pallas_src>
import functools
import math

import jax
import jax.numpy as jnp
from jax.experimental import pallas as pl
from jax.experimental.pallas import tpu as pltpu


def _choose_batch_block(batch: int, seq: int, target_rows: int = 256) -> int:
    """Largest batch block Bb (dividing batch) with Bb*seq <= target_rows,
    preferring a grid of length >= 2 so v7x's two TensorCores both get work."""
    divisors = [d for d in range(1, batch + 1) if batch % d == 0]
    preferred = [d for d in divisors if batch // d >= 2] or divisors
    fitting = [d for d in preferred if d * seq <= target_rows] or [preferred[0]]
    return max(fitting)


def _mha_kernel(x_ref, wqkv_ref, bqkv_ref, o_ref, *, num_head: int,
                bb: int, seq: int, emb: int):
    """Fused multi-head attention for one batch block.

    x_ref / o_ref : (Bb, N, E)  activation tile for this batch block
    wqkv_ref      : (E, 3E)     fused q|k|v weights, pre-transposed to (in, out),
                                q part pre-scaled by 1/sqrt(num_head)
    bqkv_ref      : (1, 3E)     fused biases (q part pre-scaled)
    """
    head_dim = emb // num_head
    rows = bb * seq

    # Flatten the batch block: one (Bb*N, E) @ (E, 3E) projection on the MXU.
    x2d = x_ref[...].reshape(rows, emb)
    qkv = jnp.dot(x2d, wqkv_ref[...],
                  preferred_element_type=jnp.float32) + bqkv_ref[...]

    q = qkv[:, :emb]              # already scaled by 1/sqrt(num_head)
    k = qkv[:, emb:2 * emb]
    v = qkv[:, 2 * emb:]

    # Single transpose for all heads / all rows in the block (hoisted out of
    # the head loop; avoids a per-head XLU relayout inside dot_general).
    kT = k.T                      # (E, Bb*N)

    out_rows = []
    for b in range(bb):                       # static unroll over batch elems
        r0 = b * seq
        qb = q[r0:r0 + seq, :]                # (N, E)
        vb = v[r0:r0 + seq, :]                # (N, E)
        head_outs = []
        for h in range(num_head):             # static unroll over heads
            c0 = h * head_dim
            # wei = q @ k^T / sqrt(num_head)   (scale folded into q)
            wei = jnp.dot(qb[:, c0:c0 + head_dim],
                          kT[c0:c0 + head_dim, r0:r0 + seq],
                          preferred_element_type=jnp.float32)       # (n_q, n_k)

            # F.softmax(wei, dim=2): dim=2 is the *query* axis -> axis 0 here.
            wei = wei - jnp.max(wei, axis=0, keepdims=True)
            p = jnp.exp(wei)
            denom = jnp.sum(p, axis=0, keepdims=True)
            wei = p * pl.reciprocal(denom, approx=True)   # divide on the EUP

            # TODO(synk): nn.Dropout(0.1) on the attention weights is identity
            # in eval mode; training-mode stochastic dropout is not implemented.

            head_outs.append(jnp.dot(wei, vb[:, c0:c0 + head_dim],
                                     preferred_element_type=jnp.float32))
        out_rows.append(jnp.concatenate(head_outs, axis=-1))        # (N, E)

    out = out_rows[0] if bb == 1 else jnp.concatenate(out_rows, axis=0)
    o_ref[...] = out.reshape(bb, seq, emb).astype(o_ref.dtype)


def multi_head_attention(x, wq, wk, wv, bq, bk, bv, *, num_head: int):
    """x: (B, N, E). w*: PyTorch nn.Linear weights (out, in). b*: (E,)."""
    B, N, E = x.shape
    assert E % num_head == 0

    scale = 1.0 / math.sqrt(num_head)   # PyTorch: / self.num_head ** 0.5

    # Fuse the three projections into one (E, 3E) weight / (1, 3E) bias, fold
    # the attention scale into the Q part, cast to the activation dtype.
    wqkv = jnp.concatenate([wq.T * scale, wk.T, wv.T], axis=1).astype(x.dtype)
    bqkv = jnp.concatenate([bq * scale, bk, bv]).reshape(1, 3 * E).astype(x.dtype)

    Bb = _choose_batch_block(B, N)
    grid = (B // Bb,)

    kernel = functools.partial(_mha_kernel, num_head=num_head,
                               bb=Bb, seq=N, emb=E)

    return pl.pallas_call(
        kernel,
        out_shape=jax.ShapeDtypeStruct((B, N, E), x.dtype),
        grid_spec=pltpu.PrefetchScalarGridSpec(
            num_scalar_prefetch=0,
            grid=grid,
            in_specs=[
                # Activations: one batch block per grid step.
                pl.BlockSpec((Bb, N, E), lambda b: (b, 0, 0)),
                # Fused weights / biases: constant index_map -> VMEM-resident.
                pl.BlockSpec((E, 3 * E), lambda b: (0, 0)),
                pl.BlockSpec((1, 3 * E), lambda b: (0, 0)),
            ],
            out_specs=pl.BlockSpec((Bb, N, E), lambda b: (b, 0, 0)),
        ),
        compiler_params=pltpu.CompilerParams(
            dimension_semantics=("parallel",),        # batch blocks split across TCs
            vmem_limit_bytes=32 * 1024 * 1024,        # explicit cap; fits every gen
        ),
    )(x, wqkv, bqkv)


def _reference(x, wq, wk, wv, bq, bk, bv, num_head):
    """Plain-JAX mirror of the PyTorch forward (eval mode)."""
    B, N, E = x.shape
    e = E // num_head
    q = x @ wq.T + bq
    k = x @ wk.T + bk
    v = x @ wv.T + bv

    def split(t):  # 'b n (h e) -> b h n e'
        return t.reshape(B, N, num_head, e).transpose(0, 2, 1, 3)

    q, k, v = split(q), split(k), split(v)
    wei = jnp.einsum('bhqe,bhke->bhqk', q, k) / math.sqrt(num_head)
    wei = jax.nn.softmax(wei, axis=2)                       # dim=2: query axis
    out = jnp.einsum('bhqk,bhke->bhqe', wei, v)
    return out.transpose(0, 2, 1, 3).reshape(B, N, E)       # 'b h n e -> b n (h e)'


if __name__ == "__main__":
    emb_size = 32
    num_head = 4
    batch = 2
    seq = 8

    key = jax.random.PRNGKey(0)
    kx, kq, kk, kv, kbq, kbk, kbv = jax.random.split(key, 7)
    s = 1.0 / math.sqrt(emb_size)

    x = jax.random.normal(kx, (batch, seq, emb_size), dtype=jnp.float32)
    wq = jax.random.uniform(kq, (emb_size, emb_size), jnp.float32, -s, s)
    wk = jax.random.uniform(kk, (emb_size, emb_size), jnp.float32, -s, s)
    wv = jax.random.uniform(kv, (emb_size, emb_size), jnp.float32, -s, s)
    bq = jax.random.uniform(kbq, (emb_size,), jnp.float32, -s, s)
    bk = jax.random.uniform(kbk, (emb_size,), jnp.float32, -s, s)
    bv = jax.random.uniform(kbv, (emb_size,), jnp.float32, -s, s)

    out = multi_head_attention(x, wq, wk, wv, bq, bk, bv, num_head=num_head)
    out = jax.block_until_ready(out)

    ref = _reference(x, wq, wk, wv, bq, bk, bv, num_head)
    assert out.shape == (batch, seq, emb_size)
    # Tolerance relaxed vs exact f32 because the softmax denominator uses the
    # EUP approximate reciprocal (rel. err ~1e-4); everything else is f32.
    err = float(jnp.max(jnp.abs(out - ref)))
    assert jnp.allclose(out, ref, atol=2e-3, rtol=2e-3), err

    print("KERNEL_OK")
</pallas_src>

<mosaic_0001>
module attributes {stable_mosaic.version = 11 : i64} {
  func.func @_mha_kernel(%arg0: i32, %arg1: memref<1x8x32xf32, #tpu.memory_space<vmem>>, %arg2: memref<32x96xf32, #tpu.memory_space<vmem>>, %arg3: memref<1x96xf32, #tpu.memory_space<vmem>>, %arg4: memref<1x8x32xf32, #tpu.memory_space<vmem>>) attributes {dimension_semantics = [#tpu.dimension_semantics<parallel>], iteration_bounds = array<i64: 2>, scalar_prefetch = 0 : i64, scratch_operands = 0 : i64, tpu.core_type = #tpu.core_type<tc>, window_params = [{transform_indices = @transform_0, window_bounds = array<i64: 1, 8, 32>}, {pipeline_mode = #tpu.pipeline_mode<synchronous>, transform_indices = @transform_1, window_bounds = array<i64: 32, 96>}, {pipeline_mode = #tpu.pipeline_mode<synchronous>, transform_indices = @transform_2, window_bounds = array<i64: 1, 96>}, {transform_indices = @transform_3, window_bounds = array<i64: 1, 8, 32>}]} {
    %c0 = arith.constant 0 : index
    %c0_0 = arith.constant 0 : index
    %c0_1 = arith.constant 0 : index
    %0 = vector.load %arg1[%c0, %c0_0, %c0_1] : memref<1x8x32xf32, #tpu.memory_space<vmem>>, vector<1x8x32xf32>
    %1 = vector.shape_cast %0 : vector<1x8x32xf32> to vector<8x32xf32>
    %c0_2 = arith.constant 0 : index
    %c0_3 = arith.constant 0 : index
    %2 = vector.load %arg2[%c0_2, %c0_3] : memref<32x96xf32, #tpu.memory_space<vmem>>, vector<32x96xf32>
    %cst = arith.constant dense<0.000000e+00> : vector<8x96xf32>
    %3 = tpu.matmul %1, %2, %cst {dimension_numbers = #tpu.dot_dimension_numbers<[1], [0], [0], [1], [0, 0, 1, 1], [], []>} : vector<8x32xf32>, vector<32x96xf32>, vector<8x96xf32> -> vector<8x96xf32>
    %c0_4 = arith.constant 0 : index
    %c0_5 = arith.constant 0 : index
    %4 = vector.load %arg3[%c0_4, %c0_5] : memref<1x96xf32, #tpu.memory_space<vmem>>, vector<1x96xf32>
    %5 = vector.broadcast %4 : vector<1x96xf32> to vector<8x96xf32>
    %6 = arith.addf %3, %5 : vector<8x96xf32>
    %7 = vector.extract_strided_slice %6 {offsets = [0, 0], sizes = [8, 32], strides = [1, 1]} : vector<8x96xf32> to vector<8x32xf32>
    %8 = vector.extract_strided_slice %6 {offsets = [0, 32], sizes = [8, 32], strides = [1, 1]} : vector<8x96xf32> to vector<8x32xf32>
    %9 = vector.extract_strided_slice %6 {offsets = [0, 64], sizes = [8, 32], strides = [1, 1]} : vector<8x96xf32> to vector<8x32xf32>
    %10 = tpu.transpose %8, [1, 0] : vector<8x32xf32> -> vector<32x8xf32>
    %11 = vector.extract_strided_slice %7 {offsets = [0, 0], sizes = [8, 8], strides = [1, 1]} : vector<8x32xf32> to vector<8x8xf32>
    %12 = vector.extract_strided_slice %10 {offsets = [0, 0], sizes = [8, 8], strides = [1, 1]} : vector<32x8xf32> to vector<8x8xf32>
    %cst_6 = arith.constant dense<0.000000e+00> : vector<8x8xf32>
    %13 = tpu.matmul %11, %12, %cst_6 {dimension_numbers = #tpu.dot_dimension_numbers<[1], [0], [0], [1], [0, 0, 1, 1], [], []>} : vector<8x8xf32>, vector<8x8xf32>, vector<8x8xf32> -> vector<8x8xf32>
    %cst_7 = arith.constant dense<0xFF800000> : vector<8xf32>
    %14 = vector.multi_reduction <maximumf>, %13, %cst_7 [0] : vector<8x8xf32> to vector<8xf32>
    %15 = vector.shape_cast %14 : vector<8xf32> to vector<1x8xf32>
    %16 = vector.broadcast %15 : vector<1x8xf32> to vector<8x8xf32>
    %17 = arith.subf %13, %16 : vector<8x8xf32>
    %18 = math.exp %17 : vector<8x8xf32>
    %cst_8 = arith.constant dense<0.000000e+00> : vector<8xf32>
    %19 = vector.multi_reduction <add>, %18, %cst_8 [0] : vector<8x8xf32> to vector<8xf32>
    %20 = vector.shape_cast %19 : vector<8xf32> to vector<1x8xf32>
    %21 = tpu.reciprocal %20 {approx = true} : vector<1x8xf32> -> vector<1x8xf32>
    %22 = vector.broadcast %21 : vector<1x8xf32> to vector<8x8xf32>
    %23 = arith.mulf %18, %22 : vector<8x8xf32>
    %24 = vector.extract_strided_slice %9 {offsets = [0, 0], sizes = [8, 8], strides = [1, 1]} : vector<8x32xf32> to vector<8x8xf32>
    %cst_9 = arith.constant dense<0.000000e+00> : vector<8x8xf32>
    %25 = tpu.matmul %23, %24, %cst_9 {dimension_numbers = #tpu.dot_dimension_numbers<[1], [0], [0], [1], [0, 0, 1, 1], [], []>} : vector<8x8xf32>, vector<8x8xf32>, vector<8x8xf32> -> vector<8x8xf32>
    %26 = vector.extract_strided_slice %7 {offsets = [0, 8], sizes = [8, 8], strides = [1, 1]} : vector<8x32xf32> to vector<8x8xf32>
    %27 = vector.extract_strided_slice %10 {offsets = [8, 0], sizes = [8, 8], strides = [1, 1]} : vector<32x8xf32> to vector<8x8xf32>
    %cst_10 = arith.constant dense<0.000000e+00> : vector<8x8xf32>
    %28 = tpu.matmul %26, %27, %cst_10 {dimension_numbers = #tpu.dot_dimension_numbers<[1], [0], [0], [1], [0, 0, 1, 1], [], []>} : vector<8x8xf32>, vector<8x8xf32>, vector<8x8xf32> -> vector<8x8xf32>
    %cst_11 = arith.constant dense<0xFF800000> : vector<8xf32>
    %29 = vector.multi_reduction <maximumf>, %28, %cst_11 [0] : vector<8x8xf32> to vector<8xf32>
    %30 = vector.shape_cast %29 : vector<8xf32> to vector<1x8xf32>
    %31 = vector.broadcast %30 : vector<1x8xf32> to vector<8x8xf32>
    %32 = arith.subf %28, %31 : vector<8x8xf32>
    %33 = math.exp %32 : vector<8x8xf32>
    %cst_12 = arith.constant dense<0.000000e+00> : vector<8xf32>
    %34 = vector.multi_reduction <add>, %33, %cst_12 [0] : vector<8x8xf32> to vector<8xf32>
    %35 = vector.shape_cast %34 : vector<8xf32> to vector<1x8xf32>
    %36 = tpu.reciprocal %35 {approx = true} : vector<1x8xf32> -> vector<1x8xf32>
    %37 = vector.broadcast %36 : vector<1x8xf32> to vector<8x8xf32>
    %38 = arith.mulf %33, %37 : vector<8x8xf32>
    %39 = vector.extract_strided_slice %9 {offsets = [0, 8], sizes = [8, 8], strides = [1, 1]} : vector<8x32xf32> to vector<8x8xf32>
    %cst_13 = arith.constant dense<0.000000e+00> : vector<8x8xf32>
    %40 = tpu.matmul %38, %39, %cst_13 {dimension_numbers = #tpu.dot_dimension_numbers<[1], [0], [0], [1], [0, 0, 1, 1], [], []>} : vector<8x8xf32>, vector<8x8xf32>, vector<8x8xf32> -> vector<8x8xf32>
    %41 = vector.extract_strided_slice %7 {offsets = [0, 16], sizes = [8, 8], strides = [1, 1]} : vector<8x32xf32> to vector<8x8xf32>
    %42 = vector.extract_strided_slice %10 {offsets = [16, 0], sizes = [8, 8], strides = [1, 1]} : vector<32x8xf32> to vector<8x8xf32>
    %cst_14 = arith.constant dense<0.000000e+00> : vector<8x8xf32>
    %43 = tpu.matmul %41, %42, %cst_14 {dimension_numbers = #tpu.dot_dimension_numbers<[1], [0], [0], [1], [0, 0, 1, 1], [], []>} : vector<8x8xf32>, vector<8x8xf32>, vector<8x8xf32> -> vector<8x8xf32>
    %cst_15 = arith.constant dense<0xFF800000> : vector<8xf32>
    %44 = vector.multi_reduction <maximumf>, %43, %cst_15 [0] : vector<8x8xf32> to vector<8xf32>
    %45 = vector.shape_cast %44 : vector<8xf32> to vector<1x8xf32>
    %46 = vector.broadcast %45 : vector<1x8xf32> to vector<8x8xf32>
    %47 = arith.subf %43, %46 : vector<8x8xf32>
    %48 = math.exp %47 : vector<8x8xf32>
    %cst_16 = arith.constant dense<0.000000e+00> : vector<8xf32>
    %49 = vector.multi_reduction <add>, %48, %cst_16 [0] : vector<8x8xf32> to vector<8xf32>
    %50 = vector.shape_cast %49 : vector<8xf32> to vector<1x8xf32>
    %51 = tpu.reciprocal %50 {approx = true} : vector<1x8xf32> -> vector<1x8xf32>
    %52 = vector.broadcast %51 : vector<1x8xf32> to vector<8x8xf32>
    %53 = arith.mulf %48, %52 : vector<8x8xf32>
    %54 = vector.extract_strided_slice %9 {offsets = [0, 16], sizes = [8, 8], strides = [1, 1]} : vector<8x32xf32> to vector<8x8xf32>
    %cst_17 = arith.constant dense<0.000000e+00> : vector<8x8xf32>
    %55 = tpu.matmul %53, %54, %cst_17 {dimension_numbers = #tpu.dot_dimension_numbers<[1], [0], [0], [1], [0, 0, 1, 1], [], []>} : vector<8x8xf32>, vector<8x8xf32>, vector<8x8xf32> -> vector<8x8xf32>
    %56 = vector.extract_strided_slice %7 {offsets = [0, 24], sizes = [8, 8], strides = [1, 1]} : vector<8x32xf32> to vector<8x8xf32>
    %57 = vector.extract_strided_slice %10 {offsets = [24, 0], sizes = [8, 8], strides = [1, 1]} : vector<32x8xf32> to vector<8x8xf32>
    %cst_18 = arith.constant dense<0.000000e+00> : vector<8x8xf32>
    %58 = tpu.matmul %56, %57, %cst_18 {dimension_numbers = #tpu.dot_dimension_numbers<[1], [0], [0], [1], [0, 0, 1, 1], [], []>} : vector<8x8xf32>, vector<8x8xf32>, vector<8x8xf32> -> vector<8x8xf32>
    %cst_19 = arith.constant dense<0xFF800000> : vector<8xf32>
    %59 = vector.multi_reduction <maximumf>, %58, %cst_19 [0] : vector<8x8xf32> to vector<8xf32>
    %60 = vector.shape_cast %59 : vector<8xf32> to vector<1x8xf32>
    %61 = vector.broadcast %60 : vector<1x8xf32> to vector<8x8xf32>
    %62 = arith.subf %58, %61 : vector<8x8xf32>
    %63 = math.exp %62 : vector<8x8xf32>
    %cst_20 = arith.constant dense<0.000000e+00> : vector<8xf32>
    %64 = vector.multi_reduction <add>, %63, %cst_20 [0] : vector<8x8xf32> to vector<8xf32>
    %65 = vector.shape_cast %64 : vector<8xf32> to vector<1x8xf32>
    %66 = tpu.reciprocal %65 {approx = true} : vector<1x8xf32> -> vector<1x8xf32>
    %67 = vector.broadcast %66 : vector<1x8xf32> to vector<8x8xf32>
    %68 = arith.mulf %63, %67 : vector<8x8xf32>
    %69 = vector.extract_strided_slice %9 {offsets = [0, 24], sizes = [8, 8], strides = [1, 1]} : vector<8x32xf32> to vector<8x8xf32>
    %cst_21 = arith.constant dense<0.000000e+00> : vector<8x8xf32>
    %70 = tpu.matmul %68, %69, %cst_21 {dimension_numbers = #tpu.dot_dimension_numbers<[1], [0], [0], [1], [0, 0, 1, 1], [], []>} : vector<8x8xf32>, vector<8x8xf32>, vector<8x8xf32> -> vector<8x8xf32>
    %71 = tpu.concatenate %25, %40, %55, %70 in 1 : vector<8x8xf32>, vector<8x8xf32>, vector<8x8xf32>, vector<8x8xf32> -> vector<8x32xf32>
    %72 = vector.shape_cast %71 : vector<8x32xf32> to vector<1x8x32xf32>
    %c0_22 = arith.constant 0 : index
    %c0_23 = arith.constant 0 : index
    %c0_24 = arith.constant 0 : index
    %73 = vector.load %arg4[%c0_22, %c0_23, %c0_24] : memref<1x8x32xf32, #tpu.memory_space<vmem>>, vector<1x8x32xf32>
    tpu.vector_store %arg4[%c0_22, %c0_23, %c0_24], %72 {strides = array<i32>} : memref<1x8x32xf32, #tpu.memory_space<vmem>>, vector<1x8x32xf32>,
    return
  }
  func.func @transform_0(%arg0: i32) -> (i32, i32, i32) {
    %c0_i32 = arith.constant 0 : i32
    %c0_i32_0 = arith.constant 0 : i32
    %c0_i32_1 = arith.constant 0 : i32
    return %arg0, %c0_i32, %c0_i32_0 : i32, i32, i32
  }
  func.func @transform_1(%arg0: i32) -> (i32, i32) {
    %c0_i32 = arith.constant 0 : i32
    %c0_i32_0 = arith.constant 0 : i32
    %c0_i32_1 = arith.constant 0 : i32
    return %c0_i32, %c0_i32_0 : i32, i32
  }
  func.func @transform_2(%arg0: i32) -> (i32, i32) {
    %c0_i32 = arith.constant 0 : i32
    %c0_i32_0 = arith.constant 0 : i32
    %c0_i32_1 = arith.constant 0 : i32
    return %c0_i32, %c0_i32_0 : i32, i32
  }
  func.func @transform_3(%arg0: i32) -> (i32, i32, i32) {
    %c0_i32 = arith.constant 0 : i32
    %c0_i32_0 = arith.constant 0 : i32
    %c0_i32_1 = arith.constant 0 : i32
    return %arg0, %c0_i32, %c0_i32_0 : i32, i32, i32
  }
}

</mosaic_0001>

<bundles_post_ra>
// kernel: tpu_custom_call.1
= control target key start
LH: loop header
LB: loop body
LE: loop exit
PB: predicated region body
PF: predicated region fallthrough
CT: control target
= control target key end

     0   :  { %8 = vsyncpa [#allocation3], 0  ;;  %s1667_s0 = inlined_call_operand.hbm [shape: f32[2,8,32], index: 0, kind: input, shape index: {}]   ;;  %s1668_s1 = inlined_call_operand.hbm [shape: f32[32,96], index: 1, kind: input, shape index: {}]   ;;  %s1669_s2 = inlined_call_operand.vmem [shape: f32[1,96], index: 2, kind: input, shape index: {}]   ;;  %s1670_s3 = inlined_call_operand.hbm [shape: f32[2,8,32], index: 3, kind: output, shape index: {}]  }
   0x1   :  { %10 = vsyncpa [#allocation3 + $0x1], 0 }
   0x2   :  { %11 = vsyncpa [#allocation6], 0 }
   0x3   :  { %12 = vsyncpa [#allocation4], 0 }
   0x4   :  { %14 = vsyncpa [#allocation4 + $0x1], 0  ;;  %s1447_s12 = smov 0   ;;  %s1449_s13 = smov 0  }
   0x5   :  { %s1451_s14 = smov 0   ;;  %s1453_s15 = smov 0  }
   0x6 LB: > { %s1468_s16 = sadd.s32 4294967295, %s1404_s15   ;;  %s1091_s17 = sadd.s32 4294967294, %s1404_s15   ;;  %s1404_s15 = sphi %s1453_s15, %s1692_s15   ;;  %s1400_s14 = sphi %s1451_s14, %s1691_s14   ;;  %s1396_s13 = sphi %s1449_s13, %s1690_s13   ;;  %s1392_s12 = sphi %s1447_s12, %s1689_s12  }
   0x7   : > { %p40_p0 = scmp.ne.s32.totalorder %s1396_s13, %s1392_s12  ;;  %p1671_p1 = scmp.eq.s32.totalorder %s1468_s16, 0 }
   0x8   : > { %p112_p3 = scmp.eq.s32.totalorder %s1091_s17, 1  ;;  %p1092_p5 = scmp.ge.s32.totalorder %s1404_s15, 1 }
   0x9   : > { %p1477_p4 = por %p1671_p1, %p40_p0  ;;  %p119_p7 = scmp.lt.s32.totalorder %s1404_s15, 3 }
   0xa   : > { %p1482_p6 = por %p112_p3, %p40_p0  ;;  %s1406_s21 = smov [#allocation5]  }
   0xb   : > { %s1675_s18 = scalar_select %p1477_p4, 1, 0 }
   0xc   : > { %s1676_s19 = scalar_select %p1482_p6, 1, 0 }
   0xd   : > { %p1487_p8 = pnand %p1092_p5, %p119_p7  ;;  %s131_s22 = sshll.u32 %s1406_s21, 4  ;;  %s132_s22 = int_to_ptr.vmem [resolvable:$true] %s131_s22 }
   0xe   : > { %s1501_s24 = sadd.s32 1, %s1404_s15   ;;  %s27_s25 = sadd.s32 1, %s1400_s14 }
   0xf   : > { %s1677_s20 = scalar_select %p1487_p8, 1, 0 }
  0x10   : > { %p1199_p9 = pneg %p1487_p8  ;;  %s24_s26 = ssub.s32 %s1404_s15, %s1501_s24 }
  0x11   : > { %s1293_s27 = scalar_lea.vmem %s132_s22, 512  ;;  %p1301_p5 = scmp.lt.s32.totalorder %s132_s22, %s132_s22 }
  0x12   : > { %p1496_p11 = pnand %p1199_p9, %p1671_p1  ;;  %p1294_p13 = scmp.ne.s32.totalorder %s132_s22, %s1293_s27 }
  0x13   : > { %p1302_p7 = scmp.lt.s32.totalorder %s1293_s27, %s1293_s27 }
  0x14   : > { %p1284_p12 = pneg %p1496_p11 }
  0x15   : > { %p1303_p10 = por %p1302_p7, %p1301_p5 }
  0x16   : > { %p1296_p0 = pnand %p1294_p13, %p1284_p12 }
  0x18   : > { %p1297_p3 = pneg %p1296_p0 }
  0x1a   : > { %p1304_p2 = pnand %p1303_p10, %p1297_p3 }
  0x1c   : > { %1307 = shalt.err (!%p1304_p2)
}
  0x1d   : > { %s1407_s28 = smov 128   ;;  %s1408_s29 = smov 8  }
  0x1e   : > { %1202 = dma.hbm_to_vmem [thread:$0]  (!%p1496_p11), %s1668_s1, 512, %s132_s22, [#allocation6], %s1407_s28, %s1407_s28, %s1408_s29  }
  0x1f   : > { %p25_p9 = scmp.eq.s32.totalorder %s24_s26, 0  ;;  %p34_p12 = scmp.ne.s32.totalorder %s1400_s14, %s1396_s13 }
  0x20   : > { %p35_p10 = scmp.eq.s32.totalorder %s1404_s15, 0  ;;  %p1212_p2 = scmp.lt.s32.totalorder %s1404_s15, 2 }
  0x21   : > { %s1518_s5 = scalar_select %p25_p9, %s1400_s14, %s27_s25  }
  0x22   : > { %p36_p13 = por %p35_p10, %p34_p12  ;;  %p1679_p0 = scmp.eq.s32.totalorder %s1468_s16, 1 }
  0x23   : > { %s148_s7 = sand.u32 1, %s1400_s14   ;;  %s1096_s8 = sshll.u32 %s1404_s15, 7 }
  0x24   : > { %p1522_p3 = por %p1679_p0, %p34_p12  ;;  %s1095_s9 = sshll.u32 %s148_s7, 3 }
  0x25   : > { %s1531_s17 = scalar_lea.hbm %s1667_s0, %s1096_s8  ;;  %s152_s21 = scalar_lea.vmem [#allocation2], %s1095_s9 }
  0x26   : > { %s1680_s6 = scalar_select %p1522_p3, 1, 0 }
  0x27   : > { %s159_s22 = sshll.u32 %s152_s21, 4  ;;  %p1533_p11 = pnand %p1212_p2, %p36_p13  ;;  %s160_s22 = int_to_ptr.vmem [resolvable:$true] %s159_s22 }
  0x28   : > { %s149_s25 = scalar_lea.sflag [#allocation3], %s148_s7  ;;  %s1308_s26 = scalar_lea.hbm %s1531_s17, 128 }
  0x29   : > { %p1309_p5 = scmp.ne.s32.totalorder %s1531_s17, %s1308_s26  ;;  %p1310_p7 = pneg %p1533_p11 }
  0x2a   : > { %s1313_s29 = scalar_lea.hbm %s1667_s0, 256  ;;  %p1314_p10 = scmp.lt.s32.totalorder %s1531_s17, %s1667_s0 }
  0x2b   : > { %p1311_p9 = pnand %p1310_p7, %p1309_p5  ;;  %p1315_p2 = scmp.lt.s32.totalorder %s1313_s29, %s1308_s26 }
  0x2d   : > { %p1312_p12 = pneg %p1311_p9  ;;  %p1316_p13 = por %p1315_p2, %p1314_p10 }
  0x2f   : > { %p1317_p0 = pnand %p1316_p13, %p1312_p12 }
  0x31   : > { %1320 = shalt.err (!%p1317_p0)
}
  0x32   : > { %s1321_s8 = scalar_lea.vmem %s160_s22, 128  ;;  %s1409_s7 = smov [#allocation2]  }
  0x33   : > { %p1322_p1 = scmp.ne.s32.totalorder %s160_s22, %s1321_s8  ;;  %s1326_s9 = sshll.u32 %s1409_s7, 4  ;;  %s1327_s9 = int_to_ptr.vmem [resolvable:$false] %s1326_s9 }
  0x34   : > { %s1328_s10 = scalar_lea.vmem %s1327_s9, 256  ;;  %p1329_p5 = scmp.lt.s32.totalorder %s160_s22, %s1327_s9 }
  0x35   : > { %p1324_p6 = pnand %p1322_p1, %p1310_p7  ;;  %p1330_p9 = scmp.lt.s32.totalorder %s1328_s10, %s1321_s8 }
  0x37   : > { %p1325_p3 = pneg %p1324_p6  ;;  %p1331_p4 = por %p1330_p9, %p1329_p5 }
  0x39   : > { %p1332_p8 = pnand %p1331_p4, %p1325_p3 }
  0x3b   : > { %1335 = shalt.err (!%p1332_p8)
}
  0x3c   : > { %1206 = dma.hbm_to_vmem [thread:$0]  (!%p1533_p11), %s1531_s17, 128, %s160_s22, %s149_s25  }
  0x3d   : > { %p1682_p12 = scmp.ne.s32.totalorder %s1677_s20, 0 }
  0x3e   : > { %s1554_s11 = sand.u32 (!%p1682_p12), 1, %s1396_s13   ;;  %p1683_p1 = scmp.ne.s32.totalorder (!%p1682_p12), %s1675_s18, 0 }
  0x3f   : > { %168 = sbr.rel (%p1682_p12) target bundleno = 982 (0x3d6), region = 32  ;;  %s1098_s21 = sshll.u32 (!%p1682_p12), %s1554_s11, 3 }
  0x40   : > { %s171_s26 = scalar_lea.sflag (!%p1682_p12), [#allocation3], %s1554_s11  ;;  %s174_s27 = scalar_lea.vmem (!%p1682_p12), [#allocation2], %s1098_s21 }
  0x44   : > { %1379 = dma.done.wait (%p1683_p1), %s171_s26, 128  }
  0x45   : > { %1381 = vsyncadd (%p1683_p1), %s171_s26, 4294967168  ;;  %p1684_p4 = scmp.eq.s32.totalorder %s1468_s16, 0 }
  0x47   : > { %1383 = dma.done.wait (%p1684_p4), [#allocation6], 512   ;;  %p1685_p6 = pmov %p1684_p4 }
  0x48   : > { %v1410_v0 = vmov 0.0   ;;  %vm1411_vm0 = vmmov 0   ;;  %v205_v1 = vld [vmem:[#allocation5 + $0x18] sm:$0xff]  ;;  %v204_v2 = vld [vmem:[#allocation5 + $0x10] sm:$0xff]  ;;  %v203_v3 = vld [vmem:[#allocation5 + $0x8] sm:$0xff]  ;;  %vm213_vm1 = vcmask 261120  }
  0x49   : > { %1385 = vsyncadd (%p1685_p6), [#allocation6], 4294966784  ;;  %1140 = vmatprep.subr.mxu0 %v1410_v0  ;;  %1148 = vmatprep.mubr.msk.f32.mxu0 %vm1411_vm0, %v1410_v0  ;;  %v202_v4 = vld [vmem:[#allocation5] sm:$0xff]  ;;  %v201_v5 = vld [vmem:[%s174_s27] sm:$0xff]  ;;  %s1412_s17 = smov 120   ;;  %s1413_s22 = smov 96  }
  0x4a   : > { %1151 = vmatprep.subr.mxu1 %v1410_v0  ;;  %1153 = vmatprep.mubr.msk.f32.mxu1 %vm1411_vm0, %v1410_v0  ;;  %v1101_v6 = vld [vmem:[%s1669_s2] ss:$0 sm:$0xff]  ;;  %s1414_s23 = smov 80   ;;  %s1415_s25 = smov 88   ;;  %vm290_vm2 = vcmask 64512   ;;  %vm992_vm3 = vcmask 130048  }
  0x4b   : > { %1141 = vmatpush3.msra.mxu0 %v205_v1  ;;  %s1416_s28 = smov 72   ;;  %s1417_s29 = smov 112   ;;  %vm994_vm4 = vcmask 195584  }
  0x4c   : > { %1142 = vmatprep.subr.mxu0 %v1410_v0  ;;  %s1418_s30 = smov 64   ;;  %s1419_s4 = smov 104  }
  0x4d   : > { %1143 = vmatpush3.msra.mxu0 %v204_v2  ;;  %s1420_s8 = smov 48   ;;  %s1421_s7 = smov 56  }
  0x4e   : > { %1144 = vmatprep.subr.mxu0 %v1410_v0  ;;  %s1422_s9 = smov 40   ;;  %s1423_s10 = smov 8  }
  0x4f   : > { %1145 = vmatpush3.msra.mxu0 %v203_v3  ;;  %s1424_s26 = smov 16   ;;  %s1425_s27 = smov 24  }
  0x50   : > { %1146 = vmatprep.subr.mxu0 %v1410_v0  ;;  %s1116_s18 = sshll.u32 %s1468_s16, 7  ;;  %s200_s20 = scalar_lea.vmem [#allocation7], %s1098_s21 }
  0x51   : > { %1147 = vmatpush3.msra.mxu0 %v202_v4  ;;  %p1686_p3 = scmp.ne.s32.totalorder %s1680_s6, 0  ;;  %s1426_s16 = smov [#allocation7]  }
  0x52   : > { %1149 = vmatmul.mubr.msk.f32.vlgmr.msra.gmra.mxu0 %vm213_vm1, %v201_v5  ;;  %1161 = vmatprep.subr.mxu0 %v1410_v0  ;;  %s1340_s21 = sshll.u32 %s1426_s16, 4  ;;  %s1341_s21 = int_to_ptr.vmem [resolvable:$false] %s1340_s21 }
  0x53   : > { %1163 = vmatprep.mubr.msk.f32.mxu0 %vm1411_vm0, %v1410_v0 }
 0x112   : > { %v283_v7 = vpop.f32.mrf.mxu0 }
 0x113   : > { %v284_v8 = vadd.f32 %v1101_v6, %v283_v7 }
 0x114   : > { %v1150_v9 = vpop.f32.mrf.mxu0 }
 0x115   : > { %460 = vrot.lane.b32.xlu1 %v284_v8, %s1412_s17  ;;  %288 = vrot.lane.b32.xlu0 %v284_v8, %s1413_s22  ;;  %s1011_s17 = sshll.u32 %s200_s20, 4  ;;  %s1012_s17 = int_to_ptr.vmem [resolvable:$true] %s1011_s17 }
 0x116   : > { %p1343_p10 = scmp.lt.s32.totalorder %s1012_s17, %s1341_s21 }
 0x119   : > { %635 = vrot.lane.b32.xlu1 %v284_v8, %s1414_s23  ;;  %462 = vrot.lane.b32.xlu0 %v284_v8, %s1415_s25  ;;  %s1629_s25 = scalar_lea.hbm %s1670_s3, %s1116_s18 }
 0x11d   : > { %808 = vrot.lane.b32.xlu1 %v284_v8, %s1416_s28  ;;  %633 = vrot.lane.b32.xlu0 %v284_v8, %s1417_s29  ;;  %s998_s28 = scalar_lea.sflag [#allocation4], %s1554_s11  ;;  %s1336_s29 = scalar_lea.vmem %s1012_s17, 128 }
 0x11e   : > { %p1337_p8 = scmp.ne.s32.totalorder %s1012_s17, %s1336_s29 }
 0x120   : > { %p1338_p11 = pnand %p1337_p8, %p1686_p3 }
 0x121   : > { %384 = vrot.lane.b32.xlu1 %v284_v8, %s1418_s30  ;;  %806 = vrot.lane.b32.xlu0 %v284_v8, %s1419_s4  ;;  %s1342_s30 = scalar_lea.vmem %s1341_s21, 256 }
 0x122   : > { %p1339_p7 = pneg %p1338_p11  ;;  %p1344_p2 = scmp.lt.s32.totalorder %s1342_s30, %s1336_s29 }
 0x124   : > { %p1345_p13 = por %p1344_p2, %p1343_p10 }
 0x125   : > { %730 = vrot.lane.b32.xlu1 %v284_v8, %s1420_s8  ;;  %557 = vrot.lane.b32.xlu0 %v284_v8, %s1421_s7 }
 0x126   : > { %p1346_p0 = pnand %p1345_p13, %p1339_p7 }
 0x129   : > { %903 = vrot.lane.b32.xlu0 %v284_v8, %s1422_s9 }
 0x187   : > { %v461_v10 = vpop.permute.xlu1 %460  ;;  %v289_v11 = vpop.permute.xlu0 %288 }
 0x188   : > { %1152 = vmatpush3.xpose.msk.msra.mxu1 %vm290_vm2, %v289_v11 }
 0x189   : > { %1156 = vmatprep.subr.mxu1 %v1410_v0 }
 0x18b   : > { %v636_v12 = vpop.permute.xlu1 %635  ;;  %1154 = vmatmul.mubr.msk.f32.vlgmr.msra.gmra.mxu1 %vm290_vm2, %v284_v8  ;;  %v463_v13 = vpop.permute.xlu0 %462 }
 0x18c   : > { %1162 = vmatpush3.xpose.msk.msra.mxu0 %vm290_vm2, %v463_v13  ;;  %1158 = vmatprep.mubr.msk.f32.mxu1 %vm1411_vm0, %v1410_v0 }
 0x18d   : > { %1171 = vmatprep.subr.mxu0 %v1410_v0 }
 0x18f   : > { %v809_v14 = vpop.permute.xlu1 %808  ;;  %1164 = vmatmul.mubr.msk.f32.vlgmr.msra.gmra.mxu0 %vm290_vm2, %v461_v10  ;;  %v634_v15 = vpop.permute.xlu0 %633 }
 0x190   : > { %1172 = vmatpush3.xpose.msk.msra.mxu0 %vm290_vm2, %v636_v12  ;;  %1173 = vmatprep.mubr.msk.f32.mxu0 %vm1411_vm0, %v1410_v0 }
 0x191   : > { %1181 = vmatprep.subr.mxu0 %v1410_v0 }
 0x193   : > { %v385_v16 = vpop.permute.xlu1 %384  ;;  %1174 = vmatmul.mubr.msk.f32.vlgmr.msra.gmra.mxu0 %vm290_vm2, %v634_v15  ;;  %v807_v17 = vpop.permute.xlu0 %806 }
 0x194   : > { %1157 = vmatpush3.msra.mxu1 %v385_v16  ;;  %1182 = vmatpush3.xpose.msk.msra.mxu0 %vm290_vm2, %v809_v14 }
 0x195   : > { %1183 = vmatprep.mubr.msk.f32.mxu0 %vm1411_vm0, %v1410_v0  ;;  %1166 = vmatprep.subr.mxu1 %v1410_v0 }
 0x197   : > { %1184 = vmatmul.mubr.msk.f32.vlgmr.msra.gmra.mxu0 %vm290_vm2, %v807_v17 }
 0x24b   : > { %v361_v18 = vpop.f32.mrf.mxu1 }
 0x24c   : > { %v365_v19 = vsel %vm290_vm2, %v361_v18, -inf }
 0x24d   : > { %v366_v20 = vrot.slane %v365_v19, 4  ;;  %v1155_v21 = vpop.f32.mrf.mxu1 }
 0x24f   : > { %v367_v22 = vmax.f32 %v365_v19, %v366_v20  ;;  %v534_v23 = vpop.f32.mrf.mxu0 }
 0x250   : > { %v538_v24 = vsel %vm290_vm2, %v534_v23, -inf }
 0x251   : > { %v368_v25 = vrot.slane %v367_v22, 2  ;;  %v539_v26 = vrot.slane %v538_v24, 4  ;;  %v1165_v27 = vpop.f32.mrf.mxu0 }
 0x253   : > { %v369_v28 = vmax.f32 %v367_v22, %v368_v25  ;;  %v540_v29 = vmax.f32 %v538_v24, %v539_v26  ;;  %v707_v30 = vpop.f32.mrf.mxu0 }
 0x254   : > { %v711_v31 = vsel %vm290_vm2, %v707_v30, -inf }
 0x255   : > { %v370_v32 = vrot.slane %v369_v28, 1  ;;  %v541_v33 = vrot.slane %v540_v29, 2  ;;  %v712_v34 = vrot.slane %v711_v31, 4  ;;  %v1175_v35 = vpop.f32.mrf.mxu0 }
 0x257   : > { %v371_v36 = vmax.f32 %v369_v28, %v370_v32  ;;  %v542_v37 = vmax.f32 %v540_v29, %v541_v33  ;;  %v713_v38 = vmax.f32 %v711_v31, %v712_v34  ;;  %v880_v39 = vpop.f32.mrf.mxu0  ;;  %v558_v33 = vpop.permute.xlu0 %557 }
 0x258   : > { %v884_v40 = vsel %vm290_vm2, %v880_v39, -inf }
 0x259   : > { %v372_v41 = vsub.f32 %v361_v18, %v371_v36  ;;  %v543_v42 = vrot.slane %v542_v37, 1  ;;  %v714_v43 = vrot.slane %v713_v38, 2  ;;  %v885_v44 = vrot.slane %v884_v40, 4  ;;  %v1185_v45 = vpop.f32.mrf.mxu0  ;;  %v731_v36 = vpop.permute.xlu1 %730 }
 0x25b   : > { %v373_v46 = vmul.f32 1.442695, %v372_v41  ;;  %v544_v47 = vmax.f32 %v542_v37, %v543_v42  ;;  %v715_v48 = vmax.f32 %v713_v38, %v714_v43  ;;  %v886_v49 = vmax.f32 %v884_v40, %v885_v44 }
 0x25d   : > { %1266 = vpow2.f32 %v373_v46  ;;  %v545_v50 = vsub.f32 %v534_v23, %v544_v47  ;;  %v716_v51 = vrot.slane %v715_v48, 1  ;;  %v887_v52 = vrot.slane %v886_v49, 2 }
 0x25f   : > { %v546_v53 = vmul.f32 1.442695, %v545_v50  ;;  %v717_v54 = vmax.f32 %v715_v48, %v716_v51  ;;  %v888_v55 = vmax.f32 %v886_v49, %v887_v52 }
 0x261   : > { %1268 = vpow2.f32 %v546_v53  ;;  %v718_v56 = vsub.f32 %v707_v30, %v717_v54  ;;  %v889_v57 = vrot.slane %v888_v55, 1 }
 0x263   : > { %v719_v58 = vmul.f32 1.442695, %v718_v56  ;;  %v890_v59 = vmax.f32 %v888_v55, %v889_v57 }
 0x265   : > { %1270 = vpow2.f32 %v719_v58  ;;  %v891_v60 = vsub.f32 %v880_v39, %v890_v59  ;;  %v904_v39 = vpop.permute.xlu0 %903 }
 0x267   : > { %v892_v61 = vmul.f32 1.442695, %v891_v60 }
 0x269   : > { %1272 = vpow2.f32 %v892_v61 }
 0x26a   : > { %v1267_v62 = vpop.eup %1266 }
 0x26b   : > { %v375_v63 = vsel %vm290_vm2, %v1267_v62, 0.0 }
 0x26c   : > { %v376_v1 = vrot.slane %v375_v63, 4 }
 0x26e   : > { %v1269_v2 = vpop.eup %1268  ;;  %v377_v3 = vadd.f32 %v376_v1, %v375_v63 }
 0x26f   : > { %v548_v4 = vsel %vm290_vm2, %v1269_v2, 0.0 }
 0x270   : > { %v378_v5 = vrot.slane %v377_v3, 2  ;;  %v549_v6 = vrot.slane %v548_v4, 4 }
 0x272   : > { %v1271_v7 = vpop.eup %1270  ;;  %v379_v8 = vadd.f32 %v378_v5, %v377_v3  ;;  %v550_v9 = vadd.f32 %v549_v6, %v548_v4 }
 0x273   : > { %v721_v10 = vsel %vm290_vm2, %v1271_v7, 0.0 }
 0x274   : > { %v380_v11 = vrot.slane %v379_v8, 1  ;;  %v551_v12 = vrot.slane %v550_v9, 2  ;;  %v722_v13 = vrot.slane %v721_v10, 4 }
 0x276   : > { %v1273_v14 = vpop.eup %1272  ;;  %v381_v15 = vadd.f32 %v380_v11, %v379_v8  ;;  %v552_v16 = vadd.f32 %v551_v12, %v550_v9  ;;  %v723_v17 = vadd.f32 %v722_v13, %v721_v10 }
 0x277   : > { %v894_v18 = vsel %vm290_vm2, %v1273_v14, 0.0 }
 0x278   : > { %1274 = vrcp.f32 %v381_v15  ;;  %v553_v19 = vrot.slane %v552_v16, 1  ;;  %v724_v20 = vrot.slane %v723_v17, 2  ;;  %v895_v21 = vrot.slane %v894_v18, 4 }
 0x27a   : > { %v554_v22 = vadd.f32 %v553_v19, %v552_v16  ;;  %v725_v23 = vadd.f32 %v724_v20, %v723_v17  ;;  %v896_v24 = vadd.f32 %v895_v21, %v894_v18 }
 0x27c   : > { %1276 = vrcp.f32 %v554_v22  ;;  %v726_v25 = vrot.slane %v725_v23, 1  ;;  %v897_v26 = vrot.slane %v896_v24, 2 }
 0x27e   : > { %v727_v27 = vadd.f32 %v726_v25, %v725_v23  ;;  %v898_v28 = vadd.f32 %v897_v26, %v896_v24 }
 0x280   : > { %1278 = vrcp.f32 %v727_v27  ;;  %v899_v29 = vrot.slane %v898_v28, 1 }
 0x282   : > { %v900_v30 = vadd.f32 %v899_v29, %v898_v28 }
 0x284   : > { %1280 = vrcp.f32 %v900_v30 }
 0x285   : > { %v1275_v31 = vpop.eup %1274 }
 0x286   : > { %v383_v32 = vmul.f32 %v1275_v31, %v1267_v62 }
 0x288   : > { %1159 = vmatmul.mubr.msk.f32.vlgmr.msra.gmra.mxu1 %vm290_vm2, %v383_v32 }
 0x289   : > { %v1277_v34 = vpop.eup %1276  ;;  %1167 = vmatpush3.msra.mxu1 %v558_v33  ;;  %1168 = vmatprep.mubr.msk.f32.mxu1 %vm1411_vm0, %v1410_v0 }
 0x28a   : > { %1176 = vmatprep.subr.mxu1 %v1410_v0  ;;  %v556_v35 = vmul.f32 %v1277_v34, %v1269_v2 }
 0x28c   : > { %1169 = vmatmul.mubr.msk.f32.vlgmr.msra.gmra.mxu1 %vm290_vm2, %v556_v35 }
 0x28d   : > { %v1279_v37 = vpop.eup %1278  ;;  %1177 = vmatpush3.msra.mxu1 %v731_v36  ;;  %1178 = vmatprep.mubr.msk.f32.mxu1 %vm1411_vm0, %v1410_v0 }
 0x28e   : > { %1186 = vmatprep.subr.mxu1 %v1410_v0  ;;  %v729_v38 = vmul.f32 %v1279_v37, %v1271_v7 }
 0x290   : > { %1179 = vmatmul.mubr.msk.f32.vlgmr.msra.gmra.mxu1 %vm290_vm2, %v729_v38 }
 0x291   : > { %v1281_v40 = vpop.eup %1280  ;;  %1187 = vmatpush3.msra.mxu1 %v904_v39  ;;  %1188 = vmatprep.mubr.msk.f32.mxu1 %vm1411_vm0, %v1410_v0 }
 0x292   : > { %v902_v41 = vmul.f32 %v1281_v40, %v1273_v14 }
 0x294   : > { %1189 = vmatmul.mubr.msk.f32.vlgmr.msra.gmra.mxu1 %vm290_vm2, %v902_v41 }
 0x348   : > { %v456_v42 = vpop.f32.mrf.mxu1 }
 0x34a   : > { %v1160_v43 = vpop.f32.mrf.mxu1 }
 0x34c   : > { %v629_v44 = vpop.f32.mrf.mxu1 }
 0x34d   : > { %980 = vrot.lane.b32.xlu1 %v629_v44, %s1423_s10 }
 0x34e   : > { %v1170_v45 = vpop.f32.mrf.mxu1 }
 0x350   : > { %v802_v46 = vpop.f32.mrf.mxu1 }
 0x351   : > { %984 = vrot.lane.b32.xlu0 %v802_v46, %s1424_s26 }
 0x352   : > { %v1180_v47 = vpop.f32.mrf.mxu1 }
 0x354   : > { %v975_v48 = vpop.f32.mrf.mxu1 }
 0x355   : > { %988 = vrot.lane.b32.xlu1 %v975_v48, %s1425_s27 }
 0x356   : > { %v1190_v0 = vpop.f32.mrf.mxu1 }
 0x3bf   : > { %v981_v49 = vpop.permute.xlu1 %980 }
 0x3c0   : > { %v991_v51 = vsel %vm290_vm2, %v456_v42, %v981_v49 }
 0x3c3   : > { %v985_v50 = vpop.permute.xlu0 %984 }
 0x3c4   : > { %v993_v52 = vsel %vm992_vm3, %v991_v51, %v985_v50 }
 0x3c7   : > { %v989_v53 = vpop.permute.xlu1 %988 }
 0x3c8   : > { %v995_v54 = vsel %vm994_vm4, %v993_v52, %v989_v53 }
 0x3c9   : > { %996 = vst.msk [vmem:[%s200_s20] sm:$0xff] %vm213_vm1, %v995_v54 }
 0x3ca   : > { %1349 = shalt.err (!%p1346_p0)
}
 0x3cb   : > { %s1350_s4 = scalar_lea.hbm %s1629_s25, 128  ;;  %s1354_s7 = scalar_lea.hbm %s1670_s3, 256 }
 0x3cc   : > { %p1351_p5 = scmp.ne.s32.totalorder %s1629_s25, %s1350_s4  ;;  %p1355_p1 = scmp.lt.s32.totalorder %s1629_s25, %s1670_s3 }
 0x3cd   : > { %p1356_p4 = scmp.lt.s32.totalorder %s1354_s7, %s1350_s4 }
 0x3ce   : > { %p1352_p9 = pnand %p1351_p5, %p1686_p3 }
 0x3cf   : > { %p1357_p6 = por %p1356_p4, %p1355_p1 }
 0x3d0   : > { %p1353_p12 = pneg %p1352_p9 }
 0x3d2   : > { %p1358_p8 = pnand %p1357_p6, %p1353_p12 }
 0x3d4   : > { %1361 = shalt.err (!%p1358_p8)
}
 0x3d5   : > { %1197 = dma.vmem_to_hbm [thread:$0]  (%p1686_p3), %s1012_s17, 128, %s1629_s25, %s998_s28  }
 0x3d6 PF: > { %s1023_s26 = sand.u32 1, %s1392_s12   ;;  %p1687_p11 = scmp.ne.s32.totalorder %s1676_s19, 0 }
 0x3d7   : > { %p1688_p7 = scmp.ge.s32.totalorder %s1404_s15, 2  ;;  %s1024_s27 = scalar_lea.sflag [#allocation4], %s1023_s26 }
 0x3d9   : > { %p1208_p10 = pnand %p1688_p7, %p1687_p11 }
 0x3db   : > { %p1209_p2 = pneg %p1208_p10 }
 0x3dd   : > { %1387 = dma.done.wait (%p1209_p2), %s1024_s27, 128  }
 0x3de   : > { %1389 = vsyncadd (%p1209_p2), %s1024_s27, 4294967168  ;;  %p17_p13 = scmp.ge.s32.totalorder %s1501_s24, 4   ;;  %s1689_s12 = smov %s1396_s13 }
 0x3df   : > { %s1690_s13 = smov %s1400_s14  ;;  %s1691_s14 = smov %s1518_s5 }
 0x3e0   : > { %s1692_s15 = smov %s1501_s24  ;;  %19 = sbr.rel (!%p17_p13) target bundleno = 6 (0x6), region = 81 }
 0x3e5   :  { %1029 = vsyncpa [#allocation3], 1 }
 0x3e6   :  { %1031 = vsyncpa [#allocation3 + $0x1], 1 }
 0x3e7   :  { %1032 = vsyncpa [#allocation6], 1 }
 0x3e8   :  { %1033 = vsyncpa [#allocation4], 1 }
 0x3e9   :  { %1035 = vsyncpa [#allocation4 + $0x1], 1 }

</bundles_post_ra>
